<compile_context>
chip_gen: v7x
topology: tpu7x:2x2x1
jax: 0.10.0
libtpu: 0.0.40
codegen_flags: <defaults>
</compile_context>

<pallas_src>
import functools

import jax
import jax.numpy as jnp
from jax import lax
from jax.experimental import pallas as pl
from jax.experimental.pallas import tpu as pltpu


def _round_up(x: int, m: int) -> int:
    return ((x + m - 1) // m) * m


def _grad_loss_kernel(x_ref, t_ref, out_ref, *, H, W, HW, HWp, clip, clipmin,
                      clipmax, loss_type):
    """Per-B-tile partial sums of the H- and W-direction gradient errors.

    x_ref, t_ref : (TB, HWp) VMEM tiles; one flattened, lane-padded image/row.
    out_ref      : (1, 2) SMEM block -> [sum_h, sum_w] partials for this tile.
    """
    x = x_ref[...].astype(jnp.float32)
    t = t_ref[...].astype(jnp.float32)
    if clip:
        x = jnp.clip(x, clipmin, clipmax)

    # (a - b) - (c - d) == (a - c) - (b - d): difference the error image once,
    # then finite-difference it (halves the subtracts / live temporaries).
    d = x - t

    # Flattened within-image index (lane position) for masking.
    idx = lax.broadcasted_iota(jnp.int32, d.shape, 1)

    def masked_sum(e, mask):
        v = jnp.abs(e) if loss_type == "L1" else e * e
        return jnp.sum(jnp.where(mask, v, 0.0))

    # H-direction: eh[i] = d[i] - d[i + W], valid for i < (H-1)*W.
    # pltpu.roll (jnp.roll semantics) by HWp-W puts element i+W at position i;
    # it runs on the XLU and avoids the relayout copy a shift-by-W slice costs.
    if H > 1:
        eh = d - pltpu.roll(d, shift=HWp - W, axis=1)
        mask_h = idx < (H - 1) * W        # also excludes lane padding & wrap
        out_ref[0, 0] = masked_sum(eh, mask_h)
    else:
        out_ref[0, 0] = jnp.float32(0.0)

    # W-direction: ew[i] = d[i] - d[i + 1], valid when i is not the last
    # column of its row (i mod W != W-1) and i is a real element (i < H*W).
    if W > 1:
        ew = d - pltpu.roll(d, shift=HWp - 1, axis=1)
        if W & (W - 1) == 0:
            col = idx & (W - 1)           # power-of-two W: cheap AND
        else:
            # TODO(synk): if vector int rem is slow/unsupported on some gen,
            # pass a precomputed per-lane column mask as a tiny extra input.
            col = lax.rem(idx, W)
        mask_w = (col != (W - 1)) & (idx < HW)
        out_ref[0, 1] = masked_sum(ew, mask_w)
    else:
        out_ref[0, 1] = jnp.float32(0.0)


def grad_loss(inp, tgt, *, loss_type="L1", clip=False, clipmin=0.0,
              clipmax=1.0, vmem_budget_bytes=24 * 1024 * 1024):
    """inp, tgt: (N, C, H, W) arrays. Returns scalar float32 loss."""
    if loss_type not in ("L1", "L2"):
        raise ValueError(f"Invalid loss_type {loss_type!r}, expected L1 or L2")
    assert inp.shape == tgt.shape and inp.ndim == 4
    N, C, H, W = inp.shape
    B, HW = N * C, H * W
    # Lane-dense layout: flatten each image to one row of H*W elements, padded
    # to a multiple of 128 lanes (narrow-W images would otherwise waste 7/8 of
    # every vreg).  Padding (if any) is masked out / zero inside the kernel.
    HWp = _round_up(max(HW, 128), 128)

    x = inp.reshape(B, HW)
    t = tgt.reshape(B, HW)

    # --- B-tile sizing: dtype-aware + working-set aware ---------------------
    # Per B-row VMEM: 2 inputs x 2 pipeline buffers at the input dtype, plus
    # ~8 f32-row temporaries in the kernel (casts, d, rolls, masked errors,
    # iota/masks).  ~24 MiB total keeps the step working set well under v7x's
    # 64 MiB/TC while per-input blocks stay ~2 MiB (roofline-flat on v5e/v6e).
    itemsize = jnp.dtype(inp.dtype).itemsize
    per_row_bytes = 4 * HWp * itemsize + 8 * HWp * 4
    tb = max(8, (vmem_budget_bytes // per_row_bytes) // 8 * 8)  # sublane mult
    tb = min(tb, _round_up(B, 8))
    if B >= 16:
        # Keep >= 2 grid blocks so both v7x TensorCores get work.
        tb = min(tb, _round_up(pl.cdiv(B, 2), 8))
    num_blocks = pl.cdiv(B, tb)
    b_padded = num_blocks * tb
    # TODO(synk): if even tb=8 exceeds the budget (huge H*W), tile the
    # flattened axis with a W-element halo instead of whole image rows.

    if b_padded != B or HWp != HW:
        # Zero padding is loss-neutral: padded images are constant (even after
        # clip) so their internal differences vanish, lane padding is masked
        # in-kernel, and the mean denominators below use the original B/H/W.
        x = jnp.pad(x, ((0, b_padded - B), (0, HWp - HW)))
        t = jnp.pad(t, ((0, b_padded - B), (0, HWp - HW)))

    kernel = functools.partial(
        _grad_loss_kernel, H=H, W=W, HW=HW, HWp=HWp, clip=bool(clip),
        clipmin=float(clipmin), clipmax=float(clipmax), loss_type=loss_type)

    partials = pl.pallas_call(
        kernel,
        out_shape=jax.ShapeDtypeStruct((num_blocks, 2), jnp.float32),
        grid=(num_blocks,),
        in_specs=[
            pl.BlockSpec((tb, HWp), lambda i: (i, 0)),
            pl.BlockSpec((tb, HWp), lambda i: (i, 0)),
        ],
        out_specs=pl.BlockSpec((1, 2), lambda i: (i, 0),
                               memory_space=pltpu.SMEM),
        compiler_params=pltpu.CompilerParams(
            dimension_semantics=("parallel",),
            vmem_limit_bytes=48 * 1024 * 1024,
        ),
    )(x, t)

    sum_h = jnp.sum(partials[:, 0])
    sum_w = jnp.sum(partials[:, 1])

    cnt_h = B * (H - 1) * W   # elements in the H-direction difference tensor
    cnt_w = B * H * (W - 1)   # elements in the W-direction difference tensor
    # TODO(synk): PyTorch returns NaN for an empty diff tensor (H==1 or W==1);
    # we return 0 for that term instead of propagating NaN.
    term_h = sum_h / cnt_h if cnt_h > 0 else jnp.float32(0.0)
    term_w = sum_w / cnt_w if cnt_w > 0 else jnp.float32(0.0)
    return (term_h + term_w).astype(jnp.float32)


def grad_loss_ref(inp, tgt, *, loss_type="L1", clip=False, clipmin=0.0,
                  clipmax=1.0):
    """Pure-JAX reference matching the PyTorch module."""
    x = inp.astype(jnp.float32)
    t = tgt.astype(jnp.float32)
    if clip:
        x = jnp.clip(x, clipmin, clipmax)
    dx_x = x[:, :, :-1, :] - x[:, :, 1:, :]
    dy_x = x[:, :, :, :-1] - x[:, :, :, 1:]
    dx_t = t[:, :, :-1, :] - t[:, :, 1:, :]
    dy_t = t[:, :, :, :-1] - t[:, :, :, 1:]
    if loss_type == "L1":
        return jnp.mean(jnp.abs(dx_x - dx_t)) + jnp.mean(jnp.abs(dy_x - dy_t))
    return jnp.mean((dx_x - dx_t) ** 2) + jnp.mean((dy_x - dy_t) ** 2)


if __name__ == "__main__":
    key = jax.random.PRNGKey(0)
    k1, k2, k3, k4 = jax.random.split(key, 4)

    # Small NCHW shapes consistent with the module's forward.
    inp = jax.random.normal(k1, (2, 4, 16, 16), dtype=jnp.float32)
    tgt = jax.random.normal(k2, (2, 4, 16, 16), dtype=jnp.float32)

    # L1, no clip (single B-tile).
    loss = grad_loss(inp, tgt, loss_type="L1", clip=False)
    jax.block_until_ready(loss)
    ref = grad_loss_ref(inp, tgt, loss_type="L1", clip=False)
    assert jnp.allclose(loss, ref, rtol=1e-5, atol=1e-5), (loss, ref)

    # bf16 inputs exercise the dtype-aware tile sizing and in-kernel cast.
    loss_bf = grad_loss(inp.astype(jnp.bfloat16), tgt.astype(jnp.bfloat16),
                        loss_type="L1", clip=False)
    jax.block_until_ready(loss_bf)
    ref_bf = grad_loss_ref(inp.astype(jnp.bfloat16), tgt.astype(jnp.bfloat16),
                           loss_type="L1", clip=False)
    assert jnp.allclose(loss_bf, ref_bf, rtol=1e-4, atol=1e-5), (loss_bf, ref_bf)

    # L2 + clip on B=15 with a tiny VMEM budget: forces a 2-block grid and the
    # B-padding path (15 -> 16 rows of 8).
    inp2 = jax.random.normal(k3, (3, 5, 16, 16), dtype=jnp.float32)
    tgt2 = jax.random.normal(k4, (3, 5, 16, 16), dtype=jnp.float32)
    loss2 = grad_loss(inp2, tgt2, loss_type="L2", clip=True, clipmin=0.0,
                      clipmax=1.0, vmem_budget_bytes=1)
    jax.block_until_ready(loss2)
    ref2 = grad_loss_ref(inp2, tgt2, loss_type="L2", clip=True, clipmin=0.0,
                         clipmax=1.0)
    assert jnp.allclose(loss2, ref2, rtol=1e-5, atol=1e-5), (loss2, ref2)

    print("KERNEL_OK")
</pallas_src>

<mosaic_0001>
module attributes {stable_mosaic.version = 11 : i64} {
  func.func @_grad_loss_kernel(%arg0: i32, %arg1: memref<8x256xf32, #tpu.memory_space<vmem>>, %arg2: memref<8x256xf32, #tpu.memory_space<vmem>>, %arg3: memref<1x2xf32, #tpu.memory_space<smem>>) attributes {dimension_semantics = [#tpu.dimension_semantics<parallel>], iteration_bounds = array<i64: 1>, scalar_prefetch = 0 : i64, scratch_operands = 0 : i64, tpu.core_type = #tpu.core_type<tc>, window_params = [{transform_indices = @transform_0, window_bounds = array<i64: 8, 256>}, {transform_indices = @transform_1, window_bounds = array<i64: 8, 256>}, {transform_indices = @transform_2, window_bounds = array<i64: 1, 2>}]} {
    %c0 = arith.constant 0 : index
    %c0_0 = arith.constant 0 : index
    %0 = vector.load %arg1[%c0, %c0_0] : memref<8x256xf32, #tpu.memory_space<vmem>>, vector<8x256xf32>
    %c0_1 = arith.constant 0 : index
    %c0_2 = arith.constant 0 : index
    %1 = vector.load %arg2[%c0_1, %c0_2] : memref<8x256xf32, #tpu.memory_space<vmem>>, vector<8x256xf32>
    %2 = arith.subf %0, %1 : vector<8x256xf32>
    %3 = tpu.iota {dimensions = array<i32: 1>} : vector<8x256xi32>
    %c240_i32 = arith.constant 240 : i32
    %4 = tpu.dynamic_rotate %2 by %c240_i32 dim 1 : vector<8x256xf32>, i32 -> vector<8x256xf32>
    %5 = arith.subf %2, %4 : vector<8x256xf32>
    %c240_i32_3 = arith.constant 240 : i32
    %6 = vector.broadcast %c240_i32_3 : i32 to vector<8x256xi32>
    %7 = arith.cmpi slt, %3, %6 : vector<8x256xi32>
    %8 = math.absf %5 : vector<8x256xf32>
    %cst = arith.constant 0.000000e+00 : f32
    %9 = vector.broadcast %cst : f32 to vector<8x256xf32>
    %10 = arith.select %7, %8, %9 : vector<8x256xi1>, vector<8x256xf32>
    %11 = vector.shape_cast %10 : vector<8x256xf32> to vector<1x8x256xf32>
    %cst_4 = arith.constant dense<0.000000e+00> : vector<1xf32>
    %12 = vector.multi_reduction <add>, %11, %cst_4 [1, 2] : vector<1x8x256xf32> to vector<1xf32>
    %13 = vector.shape_cast %12 : vector<1xf32> to vector<1x1x1xf32>
    %14 = vector.extract %13[0, 0, 0] : f32 from vector<1x1x1xf32>
    %c0_5 = arith.constant 0 : index
    %c0_6 = arith.constant 0 : index
    %15 = memref.load %arg3[%c0_5, %c0_6] : memref<1x2xf32, #tpu.memory_space<smem>>
    memref.store %14, %arg3[%c0_5, %c0_6] : memref<1x2xf32, #tpu.memory_space<smem>>
    %c255_i32 = arith.constant 255 : i32
    %16 = tpu.dynamic_rotate %2 by %c255_i32 dim 1 : vector<8x256xf32>, i32 -> vector<8x256xf32>
    %17 = arith.subf %2, %16 : vector<8x256xf32>
    %c15_i32 = arith.constant 15 : i32
    %18 = vector.broadcast %c15_i32 : i32 to vector<8x256xi32>
    %19 = arith.andi %3, %18 : vector<8x256xi32>
    %c15_i32_7 = arith.constant 15 : i32
    %20 = vector.broadcast %c15_i32_7 : i32 to vector<8x256xi32>
    %21 = arith.cmpi ne, %19, %20 : vector<8x256xi32>
    %c256_i32 = arith.constant 256 : i32
    %22 = vector.broadcast %c256_i32 : i32 to vector<8x256xi32>
    %23 = arith.cmpi slt, %3, %22 : vector<8x256xi32>
    %24 = arith.andi %21, %23 : vector<8x256xi1>
    %25 = math.absf %17 : vector<8x256xf32>
    %cst_8 = arith.constant 0.000000e+00 : f32
    %26 = vector.broadcast %cst_8 : f32 to vector<8x256xf32>
    %27 = arith.select %24, %25, %26 : vector<8x256xi1>, vector<8x256xf32>
    %28 = vector.shape_cast %27 : vector<8x256xf32> to vector<1x8x256xf32>
    %cst_9 = arith.constant dense<0.000000e+00> : vector<1xf32>
    %29 = vector.multi_reduction <add>, %28, %cst_9 [1, 2] : vector<1x8x256xf32> to vector<1xf32>
    %30 = vector.shape_cast %29 : vector<1xf32> to vector<1x1x1xf32>
    %31 = vector.extract %30[0, 0, 0] : f32 from vector<1x1x1xf32>
    %c0_10 = arith.constant 0 : index
    %c1 = arith.constant 1 : index
    %32 = memref.load %arg3[%c0_10, %c1] : memref<1x2xf32, #tpu.memory_space<smem>>
    memref.store %31, %arg3[%c0_10, %c1] : memref<1x2xf32, #tpu.memory_space<smem>>
    return
  }
  func.func @transform_0(%arg0: i32) -> (i32, i32) {
    %c0_i32 = arith.constant 0 : i32
    %c0_i32_0 = arith.constant 0 : i32
    return %arg0, %c0_i32 : i32, i32
  }
  func.func @transform_1(%arg0: i32) -> (i32, i32) {
    %c0_i32 = arith.constant 0 : i32
    %c0_i32_0 = arith.constant 0 : i32
    return %arg0, %c0_i32 : i32, i32
  }
  func.func @transform_2(%arg0: i32) -> (i32, i32) {
    %c0_i32 = arith.constant 0 : i32
    %c0_i32_0 = arith.constant 0 : i32
    return %arg0, %c0_i32 : i32, i32
  }
}

</mosaic_0001>

<bundles_post_ra>
// kernel: tpu_custom_call.1
= control target key start
LH: loop header
LB: loop body
LE: loop exit
PB: predicated region body
PF: predicated region fallthrough
CT: control target
= control target key end

     0   :  { %7 = vsyncpa [#allocation3], 0  ;;  %s245_s0 = inlined_call_operand.hbm [shape: f32[8,256], index: 0, kind: input, shape index: {}]   ;;  %s246_s1 = inlined_call_operand.hbm [shape: f32[8,256], index: 1, kind: input, shape index: {}]   ;;  %s247_s2 = inlined_call_operand.hbm [shape: f32[1,2], index: 2, kind: output, shape index: {}]  }
   0x1   :  { %8 = vsyncpa [#allocation6], 0 }
   0x2   :  { %9 = vsyncpa [#allocation4], 0  ;;  %s189_s9 = smov [#allocation2]   ;;  %s190_s11 = smov [#allocation5]  }
   0x3   :  { %s16_s10 = sshll.u32 %s189_s9, 4  ;;  %s26_s12 = sshll.u32 %s190_s11, 4  ;;  %s17_s10 = int_to_ptr.vmem [resolvable:$true] %s16_s10  ;;  %s27_s12 = int_to_ptr.vmem [resolvable:$true] %s26_s12 }
   0x4   :  { %s129_s15 = scalar_lea.hbm %s245_s0, 256 }
   0x5   :  { %p130_p0 = scmp.ne.s32.totalorder %s245_s0, %s129_s15  ;;  %p133_p1 = scmp.lt.u32.totalorder %s129_s15, %s245_s0 }
   0x7   :  { %p135_p2 = pnand %p133_p1, %p130_p0 }
   0x9   :  { %138 = shalt.err (!%p135_p2)
}
   0xa   :  { %s139_s20 = scalar_lea.vmem %s17_s10, 256  ;;  %p144_p4 = scmp.lt.s32.totalorder %s17_s10, %s17_s10 }
   0xb   :  { %p140_p3 = scmp.ne.s32.totalorder %s17_s10, %s139_s20  ;;  %p145_p5 = scmp.lt.s32.totalorder %s139_s20, %s139_s20 }
   0xd   :  { %p146_p6 = por %p145_p5, %p144_p4 }
   0xf   :  { %p147_p7 = pnand %p146_p6, %p140_p3 }
  0x11   :  { %150 = shalt.err (!%p147_p7)
}
  0x12   :  { %19 = dma.hbm_to_vmem [thread:$0]  %s245_s0, 256, %s17_s10, [#allocation3]  }
  0x13   :  { %s151_s25 = scalar_lea.hbm %s246_s1, 256 }
  0x14   :  { %p152_p8 = scmp.ne.s32.totalorder %s246_s1, %s151_s25  ;;  %p155_p9 = scmp.lt.u32.totalorder %s151_s25, %s246_s1 }
  0x16   :  { %p157_p10 = pnand %p155_p9, %p152_p8 }
  0x18   :  { %160 = shalt.err (!%p157_p10)
}
  0x19   :  { %s161_s30 = scalar_lea.vmem %s27_s12, 256  ;;  %p166_p12 = scmp.lt.s32.totalorder %s27_s12, %s27_s12 }
  0x1a   :  { %p162_p11 = scmp.ne.s32.totalorder %s27_s12, %s161_s30  ;;  %p167_p13 = scmp.lt.s32.totalorder %s161_s30, %s161_s30 }
  0x1c   :  { %p168_p0 = por %p167_p13, %p166_p12 }
  0x1e   :  { %p169_p1 = pnand %p168_p0, %p162_p11 }
  0x20   :  { %172 = shalt.err (!%p169_p1)
}
  0x21   :  { %29 = dma.hbm_to_vmem [thread:$0]  %s246_s1, 256, %s27_s12, [#allocation6]  }
  0x22   :  { %183 = dma.done.wait [#allocation3], 256  }
  0x23   :  { %184 = vsyncadd [#allocation3], 4294967040 }
  0x24   :  { %185 = dma.done.wait [#allocation6], 256  }
  0x25   :  { %186 = vsyncadd [#allocation6], 4294967040  ;;  %v36_v0 = vld [vmem:[#allocation2] sm:$0xff]  ;;  %v38_v1 = vld [vmem:[#allocation5] sm:$0xff]  ;;  %s191_s4 = smov 127   ;;  %s192_s5 = smov 112   ;;  %v42_v6 = vlaneseq }
  0x26   :  { %v37_v2 = vld [vmem:[#allocation2 + $0x8] sm:$0xff]  ;;  %v40_v3 = vsub.f32 %v36_v0, %v38_v1  ;;  %v39_v4 = vld [vmem:[#allocation5 + $0x8] sm:$0xff]  ;;  %s173_s9 = scalar_lea.hbm %s247_s2, 16 }
  0x27   :  { %v41_v5 = vsub.f32 %v37_v2, %v39_v4  ;;  %v43_v7 = vand.u32 127, %v42_v6  ;;  %p174_p2 = scmp.ne.s32.totalorder %s247_s2, %s173_s9  ;;  %p177_p3 = scmp.lt.u32.totalorder %s173_s9, %s247_s2 }
  0x28   :  { %72 = vrot.lane.b32.xlu1 %v40_v3, %s191_s4  ;;  %45 = vrot.lane.b32.xlu0 %v40_v3, %s192_s5 }
  0x29   :  { %v44_v8 = vadd.s32 128, %v43_v7  ;;  %vm76_vm0 = vcmp.lt.s32.totalorder %v43_v7, 127  ;;  %vm49_vm1 = vcmp.lt.s32.totalorder %v43_v7, 112  ;;  %v81_v11 = vand.u32 15, %v43_v7  ;;  %p179_p4 = pnand %p177_p3, %p174_p2 }
  0x2b   :  { %v82_v12 = vand.u32 15, %v44_v8  ;;  %vm83_vm2 = vcmp.ne.s32.totalorder %v81_v11, 15  ;;  %vm55_vm4 = vcmp.lt.s32.totalorder %v44_v8, 240 }
  0x2c   :  { %74 = vrot.lane.b32.xlu1 %v41_v5, %s191_s4  ;;  %47 = vrot.lane.b32.xlu0 %v41_v5, %s192_s5 }
  0x2d   :  { %vm84_vm3 = vcmp.ne.s32.totalorder %v82_v12, 15 }
  0x9a   :  { %v73_v9 = vpop.permute.xlu1 %72  ;;  %v46_v10 = vpop.permute.xlu0 %45 }
  0x9e   :  { %v75_v13 = vpop.permute.xlu1 %74  ;;  %v48_v14 = vpop.permute.xlu0 %47 }
  0x9f   :  { %v77_v15 = vsel %vm76_vm0, %v73_v9, %v75_v13  ;;  %v78_v16 = vsel %vm76_vm0, %v75_v13, %v73_v9  ;;  %v50_v17 = vsel %vm49_vm1, %v46_v10, %v48_v14  ;;  %v51_v18 = vsel %vm49_vm1, %v48_v14, %v46_v10 }
  0xa0   :  { %v79_v19 = vsub.f32 %v40_v3, %v77_v15  ;;  %v80_v20 = vsub.f32 %v41_v5, %v78_v16  ;;  %v52_v21 = vsub.f32 %v40_v3, %v50_v17  ;;  %v53_v22 = vsub.f32 %v41_v5, %v51_v18 }
  0xa2   :  { %v89_v23 = vand.u32 2147483647, %v79_v19  ;;  %v90_v24 = vand.u32 2147483647, %v80_v20  ;;  %v56_v25 = vand.u32 2147483647, %v52_v21 }
  0xa3   :  { %v57_v26 = vand.u32 2147483647, %v53_v22 }
  0xa4   :  { %v91_v27 = vsel %vm83_vm2, %v89_v23, 0.0  ;;  %v92_v28 = vsel %vm84_vm3, %v90_v24, 0.0 }
  0xa5   :  { %v93_v29 = vadd.f32 %v92_v28, %v91_v27  ;;  %v59_v30 = vsel %vm55_vm4, %v57_v26, 0.0 }
  0xa6   :  { %v60_v31 = vadd.f32 %v59_v30, %v56_v25 }
  0xa7   :  { %94 = vadd.xlane.f32.xlu1 %v93_v29 }
  0xa8   :  { %61 = vadd.xlane.f32.xlu0 %v60_v31 }
 0x134   :  { %v95_v32 = vpop.xlane.xlu1 %94 }
 0x135   :  { %v96_v33 = vrot.slane %v95_v32, 4  ;;  %v62_v34 = vpop.xlane.xlu0 %61 }
 0x136   :  { %v63_v35 = vrot.slane %v62_v34, 4 }
 0x137   :  { %v97_v36 = vadd.f32 %v96_v33, %v95_v32 }
 0x138   :  { %v64_v37 = vadd.f32 %v63_v35, %v62_v34 }
 0x139   :  { %v98_v38 = vrot.slane %v97_v36, 2 }
 0x13a   :  { %v65_v39 = vrot.slane %v64_v37, 2 }
 0x13b   :  { %v99_v40 = vadd.f32 %v98_v38, %v97_v36 }
 0x13c   :  { %v66_v41 = vadd.f32 %v65_v39, %v64_v37 }
 0x13d   :  { %v100_v42 = vrot.slane %v99_v40, 1 }
 0x13e   :  { %v67_v43 = vrot.slane %v66_v41, 1 }
 0x13f   :  { %v101_v44 = vadd.f32 %v100_v42, %v99_v40 }
 0x140   :  { %v68_v45 = vadd.f32 %v67_v43, %v66_v41 }
 0x142   :  { %120 = vpush %v68_v45 }
 0x143   :  { %122 = vpush %v101_v44 }
 0x173   :  { %s121_s1 = spop %120 }
 0x174   :  { %71 = sst [smem:[#allocation7]] %s121_s1  ;;  %s123_s6 = spop %122 }
 0x175   :  { %104 = sst [smem:[#allocation7 + $0x1]] %s123_s6 }
 0x176   :  { %182 = shalt.err (!%p179_p4)
}
 0x177   :  { %s193_s14 = smov [#allocation7]  }
 0x178   :  { %112 = dma.smem_to_hbm %s193_s14, 16, %s247_s2, [#allocation4]  }
 0x179   :  { %187 = dma.done.wait [#allocation4], 16  }
 0x17a   :  { %188 = vsyncadd [#allocation4], 4294967280 }
 0x17b   :  { %116 = sfence }
 0x17c   :  { %117 = vsyncpa [#allocation3], 1 }
 0x17d   :  { %118 = vsyncpa [#allocation6], 1 }
 0x17e   :  { %119 = vsyncpa [#allocation4], 1 }

</bundles_post_ra>
